<compile_context>
chip_gen: v7x
topology: tpu7x:2x2x1
jax: 0.10.0
libtpu: 0.0.40
codegen_flags: <defaults>
</compile_context>

<pallas_src>
import math

import jax
import jax.numpy as jnp
from jax import lax
from jax.experimental import pallas as pl
from jax.experimental.pallas import tpu as pltpu  # noqa: F401  (TPU backend extensions)

EMBED = 64
NUM_HEAD = 4
HEAD = EMBED // NUM_HEAD          # 16
BLOCK_SIZE = 8                    # max sequence length
LN_EPS = 1e-5
NEG_INF = -1e30                   # finite mask value (robust to padded rows)


def _layernorm(x, gamma, beta):
    mu = jnp.mean(x, axis=-1, keepdims=True)
    var = jnp.mean((x - mu) ** 2, axis=-1, keepdims=True)
    return (x - mu) * lax.rsqrt(var + LN_EPS) * gamma + beta


def block_kernel(x_ref, mask_ref,
                 g1_ref, b1_ref,
                 wqkv_ref, wp_ref, bp_ref,
                 g2_ref, b2_ref,
                 w1_ref, fb1_ref,
                 w2_ref, fb2_ref,
                 o_ref):
    """x_ref: (B*T, C) rows; everything fully VMEM-resident; single grid step."""
    x = x_ref[...]                                   # (R, C) f32, R = B*T
    rows = x.shape[0]

    # ---- sublayer 1: multi-head causal self-attention over LN1(x) ----
    xn = _layernorm(x, g1_ref[...], b1_ref[...])     # f32
    # Fused QKV projection: (R, C) @ (C, 3C), bf16 inputs / f32 accumulation.
    qkv = jnp.dot(xn.astype(jnp.bfloat16), wqkv_ref[...],
                  preferred_element_type=jnp.float32)        # (R, 3C) f32
    qkv16 = qkv.astype(jnp.bfloat16)

    bias = mask_ref[...]                             # (R, R) additive causal mask
    wp = wp_ref[...]                                 # (C, C) bf16
    inv_sqrt_hs = 1.0 / math.sqrt(HEAD)

    # Each head uses static lane slices of the fused QKV result, and its context
    # is folded straight into the output projection (rows h*HS:(h+1)*HS of Wp):
    # mathematically identical to concat(heads) @ Wp, but needs no concatenate.
    proj = jnp.zeros((rows, EMBED), jnp.float32)
    for h in range(NUM_HEAD):                        # static unroll (4)
        lo = h * HEAD
        qh = qkv16[:, lo:lo + HEAD]                          # (R, HS)
        kh = qkv16[:, EMBED + lo:EMBED + lo + HEAD]          # (R, HS)
        vh = qkv16[:, 2 * EMBED + lo:2 * EMBED + lo + HEAD]  # (R, HS)
        # scores over the flattened row space; cross-batch pairs are masked out.
        wei = lax.dot_general(qh, kh, (((1,), (1,)), ((), ())),
                              preferred_element_type=jnp.float32)
        wei = wei * inv_sqrt_hs + bias                       # (R, R) f32
        m = jnp.max(wei, axis=-1, keepdims=True)
        e = jnp.exp(wei - m)
        p = e * pl.reciprocal(jnp.sum(e, axis=-1, keepdims=True), approx=True)
        ctx = jnp.dot(p.astype(jnp.bfloat16), vh,
                      preferred_element_type=jnp.float32)    # (R, HS)
        proj = proj + jnp.dot(ctx.astype(jnp.bfloat16), wp[lo:lo + HEAD, :],
                              preferred_element_type=jnp.float32)
    x1 = x + proj + bp_ref[...]                              # residual 1

    # ---- sublayer 2: feed-forward over LN2(x1) ----
    xn2 = _layernorm(x1, g2_ref[...], b2_ref[...])
    h1 = jnp.dot(xn2.astype(jnp.bfloat16), w1_ref[...],
                 preferred_element_type=jnp.float32) + fb1_ref[...]
    h1 = jnp.maximum(h1, 0.0)                                # ReLU
    ff = jnp.dot(h1.astype(jnp.bfloat16), w2_ref[...],
                 preferred_element_type=jnp.float32) + fb2_ref[...]

    o_ref[...] = (x1 + ff).astype(o_ref.dtype)


@jax.jit
def transformer_block(x, params):
    B, T, C = x.shape
    assert C == EMBED and T <= BLOCK_SIZE
    R = B * T
    x2d = x.reshape(R, C)

    # Fuse Q|K|V and cast MXU weights to bf16 (f32 accumulation in-kernel).
    wqkv = jnp.concatenate(
        [params["wq"], params["wk"], params["wv"]], axis=1).astype(jnp.bfloat16)
    wp = params["wp"].astype(jnp.bfloat16)
    w1 = params["w1"].astype(jnp.bfloat16)
    w2 = params["w2"].astype(jnp.bfloat16)

    # Block-diagonal causal additive mask over the flattened B*T row space,
    # hoisted out of the kernel (constant-folded under jit). Finite, not -inf.
    idx = jnp.arange(R, dtype=jnp.int32)
    allowed = (idx[:, None] // T == idx[None, :] // T) & (idx[None, :] <= idx[:, None])
    mask_bias = jnp.where(allowed, 0.0, NEG_INF).astype(jnp.float32)

    out2d = pl.pallas_call(
        block_kernel,
        out_shape=jax.ShapeDtypeStruct((R, C), x.dtype),
        # No grid: one invocation, all operands fully VMEM-resident (<1 MiB),
        # no double-buffering of the constant weights.
        # TODO(synk): on v7x with large batches, split R over a 2-wide
        # "parallel" grid axis so both TensorCores do work.
    )(x2d, mask_bias,
      params["g1"], params["b1"],
      wqkv, wp, params["bp"],
      params["g2"], params["b2"],
      w1, params["bb1"], w2, params["bb2"])
    return out2d.reshape(B, T, C)


def init_params(key):
    """Deterministic synthetic parameters (PyTorch Linear weights pre-transposed
    to (in, out); per-head K/Q/V packed column-wise so head h owns cols
    [h*HEAD:(h+1)*HEAD], matching torch.cat over heads)."""
    ks = jax.random.split(key, 8)
    s = 0.02
    return {
        "g1": jnp.ones((1, EMBED), jnp.float32),
        "b1": jnp.zeros((1, EMBED), jnp.float32),
        "wk": s * jax.random.normal(ks[0], (EMBED, EMBED), jnp.float32),
        "wq": s * jax.random.normal(ks[1], (EMBED, EMBED), jnp.float32),
        "wv": s * jax.random.normal(ks[2], (EMBED, EMBED), jnp.float32),
        "wp": s * jax.random.normal(ks[3], (EMBED, EMBED), jnp.float32),
        "bp": s * jax.random.normal(ks[4], (1, EMBED), jnp.float32),
        "g2": jnp.ones((1, EMBED), jnp.float32),
        "b2": jnp.zeros((1, EMBED), jnp.float32),
        "w1": s * jax.random.normal(ks[5], (EMBED, 4 * EMBED), jnp.float32),
        "bb1": s * jax.random.normal(ks[6], (1, 4 * EMBED), jnp.float32),
        "w2": s * jax.random.normal(ks[7], (4 * EMBED, EMBED), jnp.float32),
        "bb2": jnp.zeros((1, EMBED), jnp.float32),
    }


def reference_block(x, p):
    """Pure-JAX f32 reference (identical math to the PyTorch module)."""
    def ln(v, g, b):
        mu = jnp.mean(v, axis=-1, keepdims=True)
        var = jnp.mean((v - mu) ** 2, axis=-1, keepdims=True)
        return (v - mu) / jnp.sqrt(var + LN_EPS) * g + b

    B, T, C = x.shape
    xn = ln(x, p["g1"], p["b1"])
    k = xn @ p["wk"]
    q = xn @ p["wq"]
    v = xn @ p["wv"]
    mask = jnp.tril(jnp.ones((T, T), bool))
    outs = []
    for h in range(NUM_HEAD):
        lo = h * HEAD
        qh, kh, vh = q[..., lo:lo + HEAD], k[..., lo:lo + HEAD], v[..., lo:lo + HEAD]
        wei = jnp.einsum("btd,bsd->bts", qh, kh) / math.sqrt(HEAD)
        wei = jnp.where(mask, wei, -jnp.inf)
        wei = jax.nn.softmax(wei, axis=-1)
        outs.append(jnp.einsum("bts,bsd->btd", wei, vh))
    att = jnp.concatenate(outs, axis=-1) @ p["wp"] + p["bp"]
    x1 = x + att
    xn2 = ln(x1, p["g2"], p["b2"])
    ff = jnp.maximum(xn2 @ p["w1"] + p["bb1"], 0.0) @ p["w2"] + p["bb2"]
    return x1 + ff


if __name__ == "__main__":
    key = jax.random.PRNGKey(0)
    kx, kp = jax.random.split(key)

    B, T = 2, BLOCK_SIZE                     # (2, 8, 64)
    x = jax.random.normal(kx, (B, T, EMBED), jnp.float32)
    params = init_params(kp)

    out = jax.block_until_ready(transformer_block(x, params))
    ref = reference_block(x, params)

    # bf16 MXU inputs with f32 accumulation -> slightly loosened, still tight check.
    if not jnp.allclose(out, ref, atol=2e-2, rtol=2e-2):
        raise AssertionError("Pallas output mismatch vs reference")

    print("KERNEL_OK")
</pallas_src>

<mosaic_0001>
module attributes {stable_mosaic.version = 11 : i64} {
  func.func @block_kernel(%arg0: memref<16x64xf32, #tpu.memory_space<vmem>>, %arg1: memref<16x16xf32, #tpu.memory_space<vmem>>, %arg2: memref<1x64xf32, #tpu.memory_space<vmem>>, %arg3: memref<1x64xf32, #tpu.memory_space<vmem>>, %arg4: memref<64x192xbf16, #tpu.memory_space<vmem>>, %arg5: memref<64x64xbf16, #tpu.memory_space<vmem>>, %arg6: memref<1x64xf32, #tpu.memory_space<vmem>>, %arg7: memref<1x64xf32, #tpu.memory_space<vmem>>, %arg8: memref<1x64xf32, #tpu.memory_space<vmem>>, %arg9: memref<64x256xbf16, #tpu.memory_space<vmem>>, %arg10: memref<1x256xf32, #tpu.memory_space<vmem>>, %arg11: memref<256x64xbf16, #tpu.memory_space<vmem>>, %arg12: memref<1x64xf32, #tpu.memory_space<vmem>>, %arg13: memref<16x64xf32, #tpu.memory_space<vmem>>) attributes {dimension_semantics = [], scalar_prefetch = 0 : i64, scratch_operands = 0 : i64, tpu.core_type = #tpu.core_type<tc>} {
    %c0 = arith.constant 0 : index
    %c0_0 = arith.constant 0 : index
    %0 = vector.load %arg0[%c0, %c0_0] : memref<16x64xf32, #tpu.memory_space<vmem>>, vector<16x64xf32>
    %c0_1 = arith.constant 0 : index
    %c0_2 = arith.constant 0 : index
    %1 = vector.load %arg2[%c0_1, %c0_2] : memref<1x64xf32, #tpu.memory_space<vmem>>, vector<1x64xf32>
    %c0_3 = arith.constant 0 : index
    %c0_4 = arith.constant 0 : index
    %2 = vector.load %arg3[%c0_3, %c0_4] : memref<1x64xf32, #tpu.memory_space<vmem>>, vector<1x64xf32>
    %cst = arith.constant dense<0.000000e+00> : vector<16xf32>
    %3 = vector.multi_reduction <add>, %0, %cst [1] : vector<16x64xf32> to vector<16xf32>
    %4 = vector.shape_cast %3 : vector<16xf32> to vector<16x1xf32>
    %cst_5 = arith.constant 6.400000e+01 : f32
    %5 = vector.broadcast %cst_5 : f32 to vector<16x1xf32>
    %6 = arith.divf %4, %5 : vector<16x1xf32>
    %7 = vector.broadcast %6 : vector<16x1xf32> to vector<16x64xf32>
    %8 = arith.subf %0, %7 : vector<16x64xf32>
    %9 = arith.mulf %8, %8 : vector<16x64xf32>
    %cst_6 = arith.constant dense<0.000000e+00> : vector<16xf32>
    %10 = vector.multi_reduction <add>, %9, %cst_6 [1] : vector<16x64xf32> to vector<16xf32>
    %11 = vector.shape_cast %10 : vector<16xf32> to vector<16x1xf32>
    %cst_7 = arith.constant 6.400000e+01 : f32
    %12 = vector.broadcast %cst_7 : f32 to vector<16x1xf32>
    %13 = arith.divf %11, %12 : vector<16x1xf32>
    %14 = vector.broadcast %6 : vector<16x1xf32> to vector<16x64xf32>
    %15 = arith.subf %0, %14 : vector<16x64xf32>
    %cst_8 = arith.constant 9.99999974E-6 : f32
    %16 = vector.broadcast %cst_8 : f32 to vector<16x1xf32>
    %17 = arith.addf %13, %16 : vector<16x1xf32>
    %18 = math.rsqrt %17 : vector<16x1xf32>
    %19 = vector.broadcast %18 : vector<16x1xf32> to vector<16x64xf32>
    %20 = arith.mulf %15, %19 : vector<16x64xf32>
    %21 = vector.broadcast %1 : vector<1x64xf32> to vector<16x64xf32>
    %22 = arith.mulf %20, %21 : vector<16x64xf32>
    %23 = vector.broadcast %2 : vector<1x64xf32> to vector<16x64xf32>
    %24 = arith.addf %22, %23 : vector<16x64xf32>
    %25 = arith.truncf %24 : vector<16x64xf32> to vector<16x64xbf16>
    %c0_9 = arith.constant 0 : index
    %c0_10 = arith.constant 0 : index
    %26 = vector.load %arg4[%c0_9, %c0_10] : memref<64x192xbf16, #tpu.memory_space<vmem>>, vector<64x192xbf16>
    %cst_11 = arith.constant dense<0.000000e+00> : vector<16x192xf32>
    %27 = tpu.matmul %25, %26, %cst_11 {dimension_numbers = #tpu.dot_dimension_numbers<[1], [0], [0], [1], [0, 0, 1, 1], [], []>} : vector<16x64xbf16>, vector<64x192xbf16>, vector<16x192xf32> -> vector<16x192xf32>
    %28 = arith.truncf %27 : vector<16x192xf32> to vector<16x192xbf16>
    %c0_12 = arith.constant 0 : index
    %c0_13 = arith.constant 0 : index
    %29 = vector.load %arg1[%c0_12, %c0_13] : memref<16x16xf32, #tpu.memory_space<vmem>>, vector<16x16xf32>
    %c0_14 = arith.constant 0 : index
    %c0_15 = arith.constant 0 : index
    %30 = vector.load %arg5[%c0_14, %c0_15] : memref<64x64xbf16, #tpu.memory_space<vmem>>, vector<64x64xbf16>
    %cst_16 = arith.constant 0.000000e+00 : f32
    %31 = vector.broadcast %cst_16 : f32 to vector<16x64xf32>
    %32 = vector.extract_strided_slice %28 {offsets = [0, 0], sizes = [16, 16], strides = [1, 1]} : vector<16x192xbf16> to vector<16x16xbf16>
    %33 = vector.extract_strided_slice %28 {offsets = [0, 64], sizes = [16, 16], strides = [1, 1]} : vector<16x192xbf16> to vector<16x16xbf16>
    %34 = vector.extract_strided_slice %28 {offsets = [0, 128], sizes = [16, 16], strides = [1, 1]} : vector<16x192xbf16> to vector<16x16xbf16>
    %cst_17 = arith.constant dense<0.000000e+00> : vector<16x16xf32>
    %35 = tpu.matmul %32, %33, %cst_17 {dimension_numbers = #tpu.dot_dimension_numbers<[1], [1], [0], [0], [0, 0, 1, 0], [], []>} : vector<16x16xbf16>, vector<16x16xbf16>, vector<16x16xf32> -> vector<16x16xf32>
    %cst_18 = arith.constant 2.500000e-01 : f32
    %36 = vector.broadcast %cst_18 : f32 to vector<16x16xf32>
    %37 = arith.mulf %35, %36 : vector<16x16xf32>
    %38 = arith.addf %37, %29 : vector<16x16xf32>
    %cst_19 = arith.constant dense<0xFF800000> : vector<16xf32>
    %39 = vector.multi_reduction <maximumf>, %38, %cst_19 [1] : vector<16x16xf32> to vector<16xf32>
    %40 = vector.shape_cast %39 : vector<16xf32> to vector<16x1xf32>
    %41 = vector.broadcast %40 : vector<16x1xf32> to vector<16x16xf32>
    %42 = arith.subf %38, %41 : vector<16x16xf32>
    %43 = math.exp %42 : vector<16x16xf32>
    %cst_20 = arith.constant dense<0.000000e+00> : vector<16xf32>
    %44 = vector.multi_reduction <add>, %43, %cst_20 [1] : vector<16x16xf32> to vector<16xf32>
    %45 = vector.shape_cast %44 : vector<16xf32> to vector<16x1xf32>
    %46 = tpu.reciprocal %45 {approx = true} : vector<16x1xf32> -> vector<16x1xf32>
    %47 = vector.broadcast %46 : vector<16x1xf32> to vector<16x16xf32>
    %48 = arith.mulf %43, %47 : vector<16x16xf32>
    %49 = arith.truncf %48 : vector<16x16xf32> to vector<16x16xbf16>
    %cst_21 = arith.constant dense<0.000000e+00> : vector<16x16xf32>
    %50 = tpu.matmul %49, %34, %cst_21 {dimension_numbers = #tpu.dot_dimension_numbers<[1], [0], [0], [1], [0, 0, 1, 1], [], []>} : vector<16x16xbf16>, vector<16x16xbf16>, vector<16x16xf32> -> vector<16x16xf32>
    %51 = arith.truncf %50 : vector<16x16xf32> to vector<16x16xbf16>
    %52 = vector.extract_strided_slice %30 {offsets = [0, 0], sizes = [16, 64], strides = [1, 1]} : vector<64x64xbf16> to vector<16x64xbf16>
    %cst_22 = arith.constant dense<0.000000e+00> : vector<16x64xf32>
    %53 = tpu.matmul %51, %52, %cst_22 {dimension_numbers = #tpu.dot_dimension_numbers<[1], [0], [0], [1], [0, 0, 1, 1], [], []>} : vector<16x16xbf16>, vector<16x64xbf16>, vector<16x64xf32> -> vector<16x64xf32>
    %54 = arith.addf %31, %53 : vector<16x64xf32>
    %55 = vector.extract_strided_slice %28 {offsets = [0, 16], sizes = [16, 16], strides = [1, 1]} : vector<16x192xbf16> to vector<16x16xbf16>
    %56 = vector.extract_strided_slice %28 {offsets = [0, 80], sizes = [16, 16], strides = [1, 1]} : vector<16x192xbf16> to vector<16x16xbf16>
    %57 = vector.extract_strided_slice %28 {offsets = [0, 144], sizes = [16, 16], strides = [1, 1]} : vector<16x192xbf16> to vector<16x16xbf16>
    %cst_23 = arith.constant dense<0.000000e+00> : vector<16x16xf32>
    %58 = tpu.matmul %55, %56, %cst_23 {dimension_numbers = #tpu.dot_dimension_numbers<[1], [1], [0], [0], [0, 0, 1, 0], [], []>} : vector<16x16xbf16>, vector<16x16xbf16>, vector<16x16xf32> -> vector<16x16xf32>
    %cst_24 = arith.constant 2.500000e-01 : f32
    %59 = vector.broadcast %cst_24 : f32 to vector<16x16xf32>
    %60 = arith.mulf %58, %59 : vector<16x16xf32>
    %61 = arith.addf %60, %29 : vector<16x16xf32>
    %cst_25 = arith.constant dense<0xFF800000> : vector<16xf32>
    %62 = vector.multi_reduction <maximumf>, %61, %cst_25 [1] : vector<16x16xf32> to vector<16xf32>
    %63 = vector.shape_cast %62 : vector<16xf32> to vector<16x1xf32>
    %64 = vector.broadcast %63 : vector<16x1xf32> to vector<16x16xf32>
    %65 = arith.subf %61, %64 : vector<16x16xf32>
    %66 = math.exp %65 : vector<16x16xf32>
    %cst_26 = arith.constant dense<0.000000e+00> : vector<16xf32>
    %67 = vector.multi_reduction <add>, %66, %cst_26 [1] : vector<16x16xf32> to vector<16xf32>
    %68 = vector.shape_cast %67 : vector<16xf32> to vector<16x1xf32>
    %69 = tpu.reciprocal %68 {approx = true} : vector<16x1xf32> -> vector<16x1xf32>
    %70 = vector.broadcast %69 : vector<16x1xf32> to vector<16x16xf32>
    %71 = arith.mulf %66, %70 : vector<16x16xf32>
    %72 = arith.truncf %71 : vector<16x16xf32> to vector<16x16xbf16>
    %cst_27 = arith.constant dense<0.000000e+00> : vector<16x16xf32>
    %73 = tpu.matmul %72, %57, %cst_27 {dimension_numbers = #tpu.dot_dimension_numbers<[1], [0], [0], [1], [0, 0, 1, 1], [], []>} : vector<16x16xbf16>, vector<16x16xbf16>, vector<16x16xf32> -> vector<16x16xf32>
    %74 = arith.truncf %73 : vector<16x16xf32> to vector<16x16xbf16>
    %75 = vector.extract_strided_slice %30 {offsets = [16, 0], sizes = [16, 64], strides = [1, 1]} : vector<64x64xbf16> to vector<16x64xbf16>
    %cst_28 = arith.constant dense<0.000000e+00> : vector<16x64xf32>
    %76 = tpu.matmul %74, %75, %cst_28 {dimension_numbers = #tpu.dot_dimension_numbers<[1], [0], [0], [1], [0, 0, 1, 1], [], []>} : vector<16x16xbf16>, vector<16x64xbf16>, vector<16x64xf32> -> vector<16x64xf32>
    %77 = arith.addf %54, %76 : vector<16x64xf32>
    %78 = vector.extract_strided_slice %28 {offsets = [0, 32], sizes = [16, 16], strides = [1, 1]} : vector<16x192xbf16> to vector<16x16xbf16>
    %79 = vector.extract_strided_slice %28 {offsets = [0, 96], sizes = [16, 16], strides = [1, 1]} : vector<16x192xbf16> to vector<16x16xbf16>
    %80 = vector.extract_strided_slice %28 {offsets = [0, 160], sizes = [16, 16], strides = [1, 1]} : vector<16x192xbf16> to vector<16x16xbf16>
    %cst_29 = arith.constant dense<0.000000e+00> : vector<16x16xf32>
    %81 = tpu.matmul %78, %79, %cst_29 {dimension_numbers = #tpu.dot_dimension_numbers<[1], [1], [0], [0], [0, 0, 1, 0], [], []>} : vector<16x16xbf16>, vector<16x16xbf16>, vector<16x16xf32> -> vector<16x16xf32>
    %cst_30 = arith.constant 2.500000e-01 : f32
    %82 = vector.broadcast %cst_30 : f32 to vector<16x16xf32>
    %83 = arith.mulf %81, %82 : vector<16x16xf32>
    %84 = arith.addf %83, %29 : vector<16x16xf32>
    %cst_31 = arith.constant dense<0xFF800000> : vector<16xf32>
    %85 = vector.multi_reduction <maximumf>, %84, %cst_31 [1] : vector<16x16xf32> to vector<16xf32>
    %86 = vector.shape_cast %85 : vector<16xf32> to vector<16x1xf32>
    %87 = vector.broadcast %86 : vector<16x1xf32> to vector<16x16xf32>
    %88 = arith.subf %84, %87 : vector<16x16xf32>
    %89 = math.exp %88 : vector<16x16xf32>
    %cst_32 = arith.constant dense<0.000000e+00> : vector<16xf32>
    %90 = vector.multi_reduction <add>, %89, %cst_32 [1] : vector<16x16xf32> to vector<16xf32>
    %91 = vector.shape_cast %90 : vector<16xf32> to vector<16x1xf32>
    %92 = tpu.reciprocal %91 {approx = true} : vector<16x1xf32> -> vector<16x1xf32>
    %93 = vector.broadcast %92 : vector<16x1xf32> to vector<16x16xf32>
    %94 = arith.mulf %89, %93 : vector<16x16xf32>
    %95 = arith.truncf %94 : vector<16x16xf32> to vector<16x16xbf16>
    %cst_33 = arith.constant dense<0.000000e+00> : vector<16x16xf32>
    %96 = tpu.matmul %95, %80, %cst_33 {dimension_numbers = #tpu.dot_dimension_numbers<[1], [0], [0], [1], [0, 0, 1, 1], [], []>} : vector<16x16xbf16>, vector<16x16xbf16>, vector<16x16xf32> -> vector<16x16xf32>
    %97 = arith.truncf %96 : vector<16x16xf32> to vector<16x16xbf16>
    %98 = vector.extract_strided_slice %30 {offsets = [32, 0], sizes = [16, 64], strides = [1, 1]} : vector<64x64xbf16> to vector<16x64xbf16>
    %cst_34 = arith.constant dense<0.000000e+00> : vector<16x64xf32>
    %99 = tpu.matmul %97, %98, %cst_34 {dimension_numbers = #tpu.dot_dimension_numbers<[1], [0], [0], [1], [0, 0, 1, 1], [], []>} : vector<16x16xbf16>, vector<16x64xbf16>, vector<16x64xf32> -> vector<16x64xf32>
    %100 = arith.addf %77, %99 : vector<16x64xf32>
    %101 = vector.extract_strided_slice %28 {offsets = [0, 48], sizes = [16, 16], strides = [1, 1]} : vector<16x192xbf16> to vector<16x16xbf16>
    %102 = vector.extract_strided_slice %28 {offsets = [0, 112], sizes = [16, 16], strides = [1, 1]} : vector<16x192xbf16> to vector<16x16xbf16>
    %103 = vector.extract_strided_slice %28 {offsets = [0, 176], sizes = [16, 16], strides = [1, 1]} : vector<16x192xbf16> to vector<16x16xbf16>
    %cst_35 = arith.constant dense<0.000000e+00> : vector<16x16xf32>
    %104 = tpu.matmul %101, %102, %cst_35 {dimension_numbers = #tpu.dot_dimension_numbers<[1], [1], [0], [0], [0, 0, 1, 0], [], []>} : vector<16x16xbf16>, vector<16x16xbf16>, vector<16x16xf32> -> vector<16x16xf32>
    %cst_36 = arith.constant 2.500000e-01 : f32
    %105 = vector.broadcast %cst_36 : f32 to vector<16x16xf32>
    %106 = arith.mulf %104, %105 : vector<16x16xf32>
    %107 = arith.addf %106, %29 : vector<16x16xf32>
    %cst_37 = arith.constant dense<0xFF800000> : vector<16xf32>
    %108 = vector.multi_reduction <maximumf>, %107, %cst_37 [1] : vector<16x16xf32> to vector<16xf32>
    %109 = vector.shape_cast %108 : vector<16xf32> to vector<16x1xf32>
    %110 = vector.broadcast %109 : vector<16x1xf32> to vector<16x16xf32>
    %111 = arith.subf %107, %110 : vector<16x16xf32>
    %112 = math.exp %111 : vector<16x16xf32>
    %cst_38 = arith.constant dense<0.000000e+00> : vector<16xf32>
    %113 = vector.multi_reduction <add>, %112, %cst_38 [1] : vector<16x16xf32> to vector<16xf32>
    %114 = vector.shape_cast %113 : vector<16xf32> to vector<16x1xf32>
    %115 = tpu.reciprocal %114 {approx = true} : vector<16x1xf32> -> vector<16x1xf32>
    %116 = vector.broadcast %115 : vector<16x1xf32> to vector<16x16xf32>
    %117 = arith.mulf %112, %116 : vector<16x16xf32>
    %118 = arith.truncf %117 : vector<16x16xf32> to vector<16x16xbf16>
    %cst_39 = arith.constant dense<0.000000e+00> : vector<16x16xf32>
    %119 = tpu.matmul %118, %103, %cst_39 {dimension_numbers = #tpu.dot_dimension_numbers<[1], [0], [0], [1], [0, 0, 1, 1], [], []>} : vector<16x16xbf16>, vector<16x16xbf16>, vector<16x16xf32> -> vector<16x16xf32>
    %120 = arith.truncf %119 : vector<16x16xf32> to vector<16x16xbf16>
    %121 = vector.extract_strided_slice %30 {offsets = [48, 0], sizes = [16, 64], strides = [1, 1]} : vector<64x64xbf16> to vector<16x64xbf16>
    %cst_40 = arith.constant dense<0.000000e+00> : vector<16x64xf32>
    %122 = tpu.matmul %120, %121, %cst_40 {dimension_numbers = #tpu.dot_dimension_numbers<[1], [0], [0], [1], [0, 0, 1, 1], [], []>} : vector<16x16xbf16>, vector<16x64xbf16>, vector<16x64xf32> -> vector<16x64xf32>
    %123 = arith.addf %100, %122 : vector<16x64xf32>
    %124 = arith.addf %0, %123 : vector<16x64xf32>
    %c0_41 = arith.constant 0 : index
    %c0_42 = arith.constant 0 : index
    %125 = vector.load %arg6[%c0_41, %c0_42] : memref<1x64xf32, #tpu.memory_space<vmem>>, vector<1x64xf32>
    %126 = vector.broadcast %125 : vector<1x64xf32> to vector<16x64xf32>
    %127 = arith.addf %124, %126 : vector<16x64xf32>
    %c0_43 = arith.constant 0 : index
    %c0_44 = arith.constant 0 : index
    %128 = vector.load %arg7[%c0_43, %c0_44] : memref<1x64xf32, #tpu.memory_space<vmem>>, vector<1x64xf32>
    %c0_45 = arith.constant 0 : index
    %c0_46 = arith.constant 0 : index
    %129 = vector.load %arg8[%c0_45, %c0_46] : memref<1x64xf32, #tpu.memory_space<vmem>>, vector<1x64xf32>
    %cst_47 = arith.constant dense<0.000000e+00> : vector<16xf32>
    %130 = vector.multi_reduction <add>, %127, %cst_47 [1] : vector<16x64xf32> to vector<16xf32>
    %131 = vector.shape_cast %130 : vector<16xf32> to vector<16x1xf32>
    %cst_48 = arith.constant 6.400000e+01 : f32
    %132 = vector.broadcast %cst_48 : f32 to vector<16x1xf32>
    %133 = arith.divf %131, %132 : vector<16x1xf32>
    %134 = vector.broadcast %133 : vector<16x1xf32> to vector<16x64xf32>
    %135 = arith.subf %127, %134 : vector<16x64xf32>
    %136 = arith.mulf %135, %135 : vector<16x64xf32>
    %cst_49 = arith.constant dense<0.000000e+00> : vector<16xf32>
    %137 = vector.multi_reduction <add>, %136, %cst_49 [1] : vector<16x64xf32> to vector<16xf32>
    %138 = vector.shape_cast %137 : vector<16xf32> to vector<16x1xf32>
    %cst_50 = arith.constant 6.400000e+01 : f32
    %139 = vector.broadcast %cst_50 : f32 to vector<16x1xf32>
    %140 = arith.divf %138, %139 : vector<16x1xf32>
    %141 = vector.broadcast %133 : vector<16x1xf32> to vector<16x64xf32>
    %142 = arith.subf %127, %141 : vector<16x64xf32>
    %cst_51 = arith.constant 9.99999974E-6 : f32
    %143 = vector.broadcast %cst_51 : f32 to vector<16x1xf32>
    %144 = arith.addf %140, %143 : vector<16x1xf32>
    %145 = math.rsqrt %144 : vector<16x1xf32>
    %146 = vector.broadcast %145 : vector<16x1xf32> to vector<16x64xf32>
    %147 = arith.mulf %142, %146 : vector<16x64xf32>
    %148 = vector.broadcast %128 : vector<1x64xf32> to vector<16x64xf32>
    %149 = arith.mulf %147, %148 : vector<16x64xf32>
    %150 = vector.broadcast %129 : vector<1x64xf32> to vector<16x64xf32>
    %151 = arith.addf %149, %150 : vector<16x64xf32>
    %152 = arith.truncf %151 : vector<16x64xf32> to vector<16x64xbf16>
    %c0_52 = arith.constant 0 : index
    %c0_53 = arith.constant 0 : index
    %153 = vector.load %arg9[%c0_52, %c0_53] : memref<64x256xbf16, #tpu.memory_space<vmem>>, vector<64x256xbf16>
    %cst_54 = arith.constant dense<0.000000e+00> : vector<16x256xf32>
    %154 = tpu.matmul %152, %153, %cst_54 {dimension_numbers = #tpu.dot_dimension_numbers<[1], [0], [0], [1], [0, 0, 1, 1], [], []>} : vector<16x64xbf16>, vector<64x256xbf16>, vector<16x256xf32> -> vector<16x256xf32>
    %c0_55 = arith.constant 0 : index
    %c0_56 = arith.constant 0 : index
    %155 = vector.load %arg10[%c0_55, %c0_56] : memref<1x256xf32, #tpu.memory_space<vmem>>, vector<1x256xf32>
    %156 = vector.broadcast %155 : vector<1x256xf32> to vector<16x256xf32>
    %157 = arith.addf %154, %156 : vector<16x256xf32>
    %cst_57 = arith.constant 0.000000e+00 : f32
    %158 = vector.broadcast %cst_57 : f32 to vector<16x256xf32>
    %159 = arith.maximumf %157, %158 : vector<16x256xf32>
    %160 = arith.truncf %159 : vector<16x256xf32> to vector<16x256xbf16>
    %c0_58 = arith.constant 0 : index
    %c0_59 = arith.constant 0 : index
    %161 = vector.load %arg11[%c0_58, %c0_59] : memref<256x64xbf16, #tpu.memory_space<vmem>>, vector<256x64xbf16>
    %cst_60 = arith.constant dense<0.000000e+00> : vector<16x64xf32>
    %162 = tpu.matmul %160, %161, %cst_60 {dimension_numbers = #tpu.dot_dimension_numbers<[1], [0], [0], [1], [0, 0, 1, 1], [], []>} : vector<16x256xbf16>, vector<256x64xbf16>, vector<16x64xf32> -> vector<16x64xf32>
    %c0_61 = arith.constant 0 : index
    %c0_62 = arith.constant 0 : index
    %163 = vector.load %arg12[%c0_61, %c0_62] : memref<1x64xf32, #tpu.memory_space<vmem>>, vector<1x64xf32>
    %164 = vector.broadcast %163 : vector<1x64xf32> to vector<16x64xf32>
    %165 = arith.addf %162, %164 : vector<16x64xf32>
    %166 = arith.addf %127, %165 : vector<16x64xf32>
    %c0_63 = arith.constant 0 : index
    %c0_64 = arith.constant 0 : index
    %167 = vector.load %arg13[%c0_63, %c0_64] : memref<16x64xf32, #tpu.memory_space<vmem>>, vector<16x64xf32>
    tpu.vector_store %arg13[%c0_63, %c0_64], %166 {strides = array<i32>} : memref<16x64xf32, #tpu.memory_space<vmem>>, vector<16x64xf32>,
    return
  }
}

</mosaic_0001>

<bundles_post_ra>
// kernel: transformer_block.1
= control target key start
LH: loop header
LB: loop body
LE: loop exit
PB: predicated region body
PF: predicated region fallthrough
CT: control target
= control target key end

     0   :  { %vm50_vm0 = vcmask 523264   ;;  %s1944_s0 = inlined_call_operand.vmem [shape: f32[16,64], index: 0, kind: input, shape index: {}]   ;;  %s1945_s1 = inlined_call_operand.vmem [shape: f32[16,16], index: 1, kind: input, shape index: {}]   ;;  %s1946_s2 = inlined_call_operand.vmem [shape: f32[1,64], index: 2, kind: input, shape index: {}]   ;;  %s1947_s3 = inlined_call_operand.vmem [shape: f32[1,64], index: 3, kind: input, shape index: {}]   ;;  %s1948_s4 = inlined_call_operand.vmem [shape: bf16[64,192], index: 4, kind: input, shape index: {}]   ;;  %s1949_s5 = inlined_call_operand.vmem [shape: bf16[64,64], index: 5, kind: input, shape index: {}]   ;;  %s1950_s6 = inlined_call_operand.vmem [shape: f32[1,64], index: 6, kind: input, shape index: {}]   ;;  %s1951_s7 = inlined_call_operand.vmem [shape: f32[1,64], index: 7, kind: input, shape index: {}]   ;;  %s1952_s8 = inlined_call_operand.vmem [shape: f32[1,64], index: 8, kind: input, shape index: {}]   ;;  %s1953_s9 = inlined_call_operand.vmem [shape: bf16[64,256], index: 9, kind: input, shape index: {}]   ;;  %s1954_s10 = inlined_call_operand.vmem [shape: f32[1,256], index: 10, kind: input, shape index: {}]   ;;  %s1955_s11 = inlined_call_operand.vmem [shape: bf16[256,64], index: 11, kind: input, shape index: {}]   ;;  %s1956_s12 = inlined_call_operand.vmem [shape: f32[1,64], index: 12, kind: input, shape index: {}]   ;;  %s1957_s13 = inlined_call_operand.hbm [shape: f32[16,64], index: 13, kind: output, shape index: {}]  }
   0x1   :  { %v1652_v0 = vld [vmem:[%s1944_s0] sm:$0xff]  ;;  %v1657_v1 = vld [vmem:[%s1944_s0 + $0x8] sm:$0xff] }
   0x2   :  { %v51_v2 = vsel %vm50_vm0, %v1652_v0, 0.0  ;;  %v54_v3 = vsel %vm50_vm0, %v1657_v1, 0.0 }
   0x3   :  { %52 = vadd.xlane.f32.xlu0 %v51_v2 }
   0x7   :  { %55 = vadd.xlane.f32.xlu0 %v54_v3 }
   0x8   :  { %18 = vsyncpa [#allocation3], 0  ;;  %v1458_v14 = vld [vmem:[%s1948_s4 + $0x4] ss:$8 sps:$4 sm:$0xff]   ;;  %v1460_v15 = vld [vmem:[%s1948_s4] ss:$8 sps:$4 sm:$0xff]  }
   0x9   :  { %146 = vmatprep.subr.bf16.mxu0 %v1458_v14  ;;  %v1461_v16 = vld [vmem:[%s1948_s4 + $0x14] ss:$8 sps:$4 sm:$0xff]   ;;  %v1463_v17 = vld [vmem:[%s1948_s4 + $0x10] ss:$8 sps:$4 sm:$0xff]   ;;  %v1464_v18 = vld [vmem:[%s1948_s4 + $0x24] ss:$8 sps:$4 sm:$0xff]  }
   0xa   :  { %147 = vmatpush1.bf16.msra.mxu0 %v1460_v15  ;;  %v1466_v19 = vld [vmem:[%s1948_s4 + $0x20] ss:$8 sps:$4 sm:$0xff]   ;;  %v1467_v20 = vld [vmem:[%s1948_s4 + $0x34] ss:$8 sps:$4 sm:$0xff]   ;;  %v1469_v21 = vld [vmem:[%s1948_s4 + $0x30] ss:$8 sps:$4 sm:$0xff]  }
   0xb   :  { %148 = vmatprep.subr.bf16.mxu0 %v1461_v16  ;;  %v1566_v22 = vmov 0   ;;  %v1271_v31 = vld [vmem:[%s1946_s2] ss:$0 sm:$0xff]  ;;  %v1567_v40 = vmov 0.0   ;;  %vm1568_vm1 = vmmov 0   ;;  %s1569_s2 = smov 48  }
   0xc   :  { %178 = vmatprep.mubr.bf16.mxu0 %v1566_v22  ;;  %v1272_v35 = vld [vmem:[%s1947_s3] ss:$0 sm:$0xff]  ;;  %1379 = vmatprep.subr.bf16.mxu1 %v1567_v40  ;;  %s1570_s3 = smov 64   ;;  %s1571_s29 = smov 112   ;;  %vm204_vm2 = vcmask 130048   ;;  %v1734_v57 = vld [vmem:[%s1945_s1 + $0x8] sm:$0xff] }
   0xd   :  { %1381 = vmatprep.mubr.msk.bf16.mxu1 %vm1568_vm1, %v1567_v40  ;;  %v1729_v53 = vld [vmem:[%s1945_s1] sm:$0xff]  ;;  %s1572_s1 = smov 96   ;;  %s1573_s17 = smov 32  }
   0xe   :  { %149 = vmatpush1.bf16.msra.mxu0 %v1463_v17  ;;  %s1574_s22 = smov 16   ;;  %s1575_s23 = smov 80  }
   0xf   :  { %150 = vmatprep.subr.bf16.mxu0 %v1464_v18  ;;  %s1576_s0 = smov [#allocation2]  }
  0x12   :  { %151 = vmatpush1.bf16.msra.mxu0 %v1466_v19 }
  0x13   :  { %152 = vmatprep.subr.bf16.mxu0 %v1467_v20 }
  0x16   :  { %153 = vmatpush1.bf16.msra.mxu0 %v1469_v21 }
  0x17   :  { %1373 = vmatprep.subr.bf16.mxu0 %v1567_v40 }
  0x90   :  { %v53_v4 = vpop.xlane.xlu0 %52 }
  0x91   :  { %v58_v5 = vmul.f32 0.015625, %v53_v4 }
  0x93   :  { %v60_v6 = vsub.f32 %v1652_v0, %v58_v5 }
  0x94   :  { %v56_v7 = vpop.xlane.xlu0 %55 }
  0x95   :  { %v59_v8 = vmul.f32 0.015625, %v56_v7  ;;  %v62_v9 = vmul.f32 %v60_v6, %v60_v6 }
  0x97   :  { %v61_v10 = vsub.f32 %v1657_v1, %v59_v8  ;;  %v64_v11 = vsel %vm50_vm0, %v62_v9, 0.0 }
  0x98   :  { %65 = vadd.xlane.f32.xlu1 %v64_v11 }
  0x99   :  { %v63_v12 = vmul.f32 %v61_v10, %v61_v10 }
  0x9b   :  { %v67_v13 = vsel %vm50_vm0, %v63_v12, 0.0 }
  0x9c   :  { %68 = vadd.xlane.f32.xlu1 %v67_v13 }
 0x125   :  { %v66_v23 = vpop.xlane.xlu1 %65 }
 0x126   :  { %v70_v24 = vmul.f32 0.015625, %v66_v23 }
 0x128   :  { %v72_v25 = vadd.f32 1e-05, %v70_v24 }
 0x129   :  { %v69_v26 = vpop.xlane.xlu1 %68 }
 0x12a   :  { %1502 = vrsqrt.f32 %v72_v25  ;;  %v71_v27 = vmul.f32 0.015625, %v69_v26 }
 0x12c   :  { %v73_v28 = vadd.f32 1e-05, %v71_v27 }
 0x12e   :  { %1504 = vrsqrt.f32 %v73_v28 }
 0x134   :  { %v1503_v29 = vpop.eup %1502 }
 0x135   :  { %v76_v30 = vmul.f32 %v1503_v29, %v60_v6 }
 0x137   :  { %v84_v34 = vmul.f32 %v1271_v31, %v76_v30 }
 0x138   :  { %v1505_v32 = vpop.eup %1504 }
 0x139   :  { %v77_v33 = vmul.f32 %v1505_v32, %v61_v10  ;;  %v92_v37 = vadd.f32 %v1272_v35, %v84_v34 }
 0x13b   :  { %v85_v36 = vmul.f32 %v1271_v31, %v77_v33 }
 0x13d   :  { %v93_v38 = vadd.f32 %v1272_v35, %v85_v36 }
 0x13f   :  { %v94_v39 = vpack.c.bf16 %v93_v38, %v92_v37 }
 0x141   :  { %1281 = vmatmul.mubr.msk.bf16.vlgmr.msra.gmra.mrb[0].mxu0 %vm50_vm0, %v94_v39 }
 0x142   :  { %1375 = vmatprep.mubr.msk.bf16.mxu0 %vm1568_vm1, %v1567_v40 }
 0x214   :  { %v180_v41 = vpop.f32.mrb[0].mxu0 }
 0x215   :  { %v182_v42 = vpop.f32.mrb[1].mxu0 }
 0x216   :  { %v184_v43 = vpop.f32.mrb[2].mxu0 }
 0x217   :  { %v1705_v44 = vpack.c.bf16 %v184_v43, %v180_v41  ;;  %v186_v45 = vpop.f32.mrb[3].mxu0 }
 0x218   :  { %v1707_v46 = vpack.c.bf16 %v186_v45, %v182_v42 }
 0x219   :  { %326 = vrot.lane.b32.xlu1 %v1705_v44, %s1569_s2  ;;  %202 = vrot.lane.b32.xlu0 %v1705_v44, %s1570_s3  ;;  %s1260_s2 = sshll.u32 %s1576_s0, 4  ;;  %s1261_s2 = int_to_ptr.vmem [resolvable:$true] %s1260_s2 }
 0x21a   :  { %1380 = vmatpush3.bf16.msra.mxu1 %v1707_v46  ;;  %s1542_s3 = scalar_lea.vmem %s1261_s2, 256  ;;  %p1547_p1 = scmp.lt.s32.totalorder %s1261_s2, %s1261_s2 }
 0x21b   :  { %1391 = vmatprep.subr.bf16.mxu1 %v1567_v40  ;;  %p1543_p0 = scmp.ne.s32.totalorder %s1261_s2, %s1542_s3  ;;  %p1548_p2 = scmp.lt.s32.totalorder %s1542_s3, %s1542_s3 }
 0x21d   :  { %324 = vrot.lane.b32.xlu1 %v1705_v44, %s1571_s29  ;;  %p1549_p3 = por %p1548_p2, %p1547_p1 }
 0x21f   :  { %p1550_p4 = pnand %p1549_p3, %p1543_p0 }
 0x28b   :  { %v203_v47 = vpop.permute.xlu0 %202  ;;  %v327_v49 = vpop.permute.xlu1 %326 }
 0x28c   :  { %v209_v48 = vsel %vm204_vm2, %v203_v47, 0  ;;  %v332_v50 = vsel %vm204_vm2, %v327_v49, 0 }
 0x28d   :  { %1374 = vmatpush3.bf16.xpose.msra.mxu0 %v209_v48 }
 0x28e   :  { %1385 = vmatprep.subr.bf16.mxu0 %v1567_v40 }
 0x28f   :  { %v325_v51 = vpop.permute.xlu1 %324 }
 0x294   :  { %1376 = vmatmul.mubr.msk.bf16.vlgmr.msra.gmra.mrb[4].mxu0 %vm204_vm2, %v1705_v44 }
 0x295   :  { %1386 = vmatpush3.bf16.xpose.msra.mxu0 %v332_v50  ;;  %1387 = vmatprep.mubr.msk.bf16.mxu0 %vm1568_vm1, %v1567_v40 }
 0x296   :  { %1397 = vmatprep.subr.bf16.mxu0 %v1567_v40 }
 0x29c   :  { %1388 = vmatmul.mubr.msk.bf16.vlgmr.msra.gmra.mrb[8].mxu0 %vm204_vm2, %v325_v51  ;;  %v1470_v51 = vld [vmem:[%s1949_s5] sm:$0xff]  }
 0x29d   :  { %1399 = vmatprep.mubr.msk.bf16.mxu0 %vm1568_vm1, %v1567_v40 }
 0x367   :  { %v245_v52 = vpop.f32.mrb[4].mxu0 }
 0x368   :  { %v252_v54 = vmul.f32 0.25, %v245_v52  ;;  %v1377_v55 = vpop.f32.mrb[5].mxu0  ;;  %v1471_v52 = vld [vmem:[%s1949_s5 + $0x8] sm:$0xff]  }
 0x369   :  { %v248_v56 = vpop.f32.mrb[6].mxu0  ;;  %1398 = vmatpush3.bf16.msra.mxu0 %v1471_v52 }
 0x36a   :  { %v253_v58 = vmul.f32 0.25, %v248_v56  ;;  %v1378_v59 = vpop.f32.mrb[7].mxu0  ;;  %v254_v60 = vadd.f32 %v252_v54, %v1729_v53  ;;  %1409 = vmatprep.subr.bf16.mxu0 %v1567_v40 }
 0x36c   :  { %v256_v61 = vsel %vm204_vm2, %v254_v60, -inf  ;;  %v255_v62 = vadd.f32 %v253_v58, %v1734_v57 }
 0x36d   :  { %257 = vmax.xlane.f32.xlu1 %v256_v61 }
 0x36e   :  { %v259_v63 = vsel %vm204_vm2, %v255_v62, -inf }
 0x36f   :  { %260 = vmax.xlane.f32.xlu0 %v259_v63  ;;  %v368_v2 = vpop.f32.mrb[8].mxu0 }
 0x370   :  { %v375_v3 = vmul.f32 0.25, %v368_v2  ;;  %v1389_v4 = vpop.f32.mrb[9].mxu0 }
 0x371   :  { %v371_v5 = vpop.f32.mrb[10].mxu0 }
 0x372   :  { %v376_v6 = vmul.f32 0.25, %v371_v5  ;;  %v1390_v7 = vpop.f32.mrb[11].mxu0  ;;  %v377_v8 = vadd.f32 %v375_v3, %v1729_v53 }
 0x374   :  { %v379_v9 = vsel %vm204_vm2, %v377_v8, -inf  ;;  %v378_v10 = vadd.f32 %v376_v6, %v1734_v57 }
 0x375   :  { %380 = vmax.xlane.f32.xlu0 %v379_v9 }
 0x376   :  { %v382_v11 = vsel %vm204_vm2, %v378_v10, -inf }
 0x379   :  { %383 = vmax.xlane.f32.xlu0 %v382_v11 }
 0x3fa   :  { %v258_v12 = vpop.xlane.xlu1 %257 }
 0x3fb   :  { %v262_v13 = vsub.f32 %v254_v60, %v258_v12 }
 0x3fc   :  { %v261_v14 = vpop.xlane.xlu0 %260 }
 0x3fd   :  { %v264_v15 = vmul.f32 1.442695, %v262_v13  ;;  %v263_v16 = vsub.f32 %v255_v62, %v261_v14 }
 0x3ff   :  { %1506 = vpow2.f32 %v264_v15  ;;  %v266_v17 = vmul.f32 1.442695, %v263_v16 }
 0x401   :  { %1508 = vpow2.f32 %v266_v17 }
 0x402   :  { %v381_v18 = vpop.xlane.xlu0 %380 }
 0x403   :  { %v385_v19 = vsub.f32 %v377_v8, %v381_v18 }
 0x405   :  { %v387_v20 = vmul.f32 1.442695, %v385_v19 }
 0x406   :  { %v384_v21 = vpop.xlane.xlu0 %383 }
 0x407   :  { %1510 = vpow2.f32 %v387_v20  ;;  %v386_v23 = vsub.f32 %v378_v10, %v384_v21 }
 0x409   :  { %v1507_v24 = vpop.eup %1506  ;;  %v389_v25 = vmul.f32 1.442695, %v386_v23 }
 0x40a   :  { %v268_v26 = vsel %vm204_vm2, %v1507_v24, 0.0 }
 0x40b   :  { %v1509_v27 = vpop.eup %1508  ;;  %1512 = vpow2.f32 %v389_v25  ;;  %269 = vadd.xlane.f32.xlu1 %v268_v26 }
 0x40c   :  { %v271_v28 = vsel %vm204_vm2, %v1509_v27, 0.0 }
 0x40d   :  { %272 = vadd.xlane.f32.xlu0 %v271_v28 }
 0x411   :  { %v1511_v29 = vpop.eup %1510 }
 0x412   :  { %v391_v30 = vsel %vm204_vm2, %v1511_v29, 0.0 }
 0x413   :  { %392 = vadd.xlane.f32.xlu1 %v391_v30 }
 0x415   :  { %v1513_v31 = vpop.eup %1512 }
 0x416   :  { %v394_v32 = vsel %vm204_vm2, %v1513_v31, 0.0 }
 0x417   :  { %395 = vadd.xlane.f32.xlu0 %v394_v32 }
 0x424   :  { %403 = vrot.lane.b32.xlu1 %v1707_v46, %s1571_s29 }
 0x428   :  { %551 = vrot.lane.b32.xlu1 %v1705_v44, %s1572_s1 }
 0x42d   :  { %553 = vrot.lane.b32.xlu0 %v1705_v44, %s1573_s17 }
 0x498   :  { %v270_v33 = vpop.xlane.xlu1 %269 }
 0x499   :  { %1514 = vrcp.f32 %v270_v33 }
 0x49a   :  { %v273_v34 = vpop.xlane.xlu0 %272 }
 0x49b   :  { %1516 = vrcp.f32 %v273_v34 }
 0x4a0   :  { %v393_v35 = vpop.xlane.xlu1 %392 }
 0x4a1   :  { %1518 = vrcp.f32 %v393_v35 }
 0x4a3   :  { %v1515_v36 = vpop.eup %1514 }
 0x4a4   :  { %v396_v37 = vpop.xlane.xlu0 %395  ;;  %v276_v39 = vmul.f32 %v1515_v36, %v1507_v24  ;;  %v404_v43 = vpop.permute.xlu1 %403 }
 0x4a5   :  { %v1517_v38 = vpop.eup %1516  ;;  %1520 = vrcp.f32 %v396_v37 }
 0x4a6   :  { %v277_v41 = vmul.f32 %v1517_v38, %v1509_v27 }
 0x4a8   :  { %v278_v42 = vpack.c.bf16 %v277_v41, %v276_v39  ;;  %v554_v62 = vpop.permute.xlu0 %553  ;;  %v552_v5 = vpop.permute.xlu1 %551 }
 0x4a9   :  { %v559_v4 = vsel %vm204_vm2, %v554_v62, 0 }
 0x4aa   :  { %1382 = vmatmul.mubr.msk.bf16.vlgmr.msra.gmra.mrb[0].mxu1 %vm204_vm2, %v278_v42 }
 0x4ab   :  { %1392 = vmatpush3.bf16.msra.mxu1 %v404_v43  ;;  %1393 = vmatprep.mubr.msk.bf16.mxu1 %vm1568_vm1, %v1567_v40  ;;  %v1519_v45 = vpop.eup %1518 }
 0x4ac   :  { %1403 = vmatprep.subr.bf16.mxu1 %v1567_v40  ;;  %v399_v48 = vmul.f32 %v1519_v45, %v1511_v29 }
 0x4af   :  { %v1521_v47 = vpop.eup %1520 }
 0x4b0   :  { %v400_v49 = vmul.f32 %v1521_v47, %v1513_v31 }
 0x4b2   :  { %v401_v50 = vpack.c.bf16 %v400_v49, %v399_v48 }
 0x4b4   :  { %1394 = vmatmul.mubr.msk.bf16.vlgmr.msra.gmra.mrb[4].mxu1 %vm204_vm2, %v401_v50  ;;  %v1472_v50 = vld [vmem:[%s1949_s5 + $0x10] sm:$0xff]  }
 0x4b5   :  { %1405 = vmatprep.mubr.msk.bf16.mxu1 %vm1568_vm1, %v1567_v40  ;;  %1404 = vmatpush3.bf16.msra.mxu1 %v1470_v51 }
 0x4b6   :  { %1415 = vmatprep.subr.bf16.mxu1 %v1567_v40 }
 0x57d   :  { %v316_v54 = vpop.f32.mrb[0].mxu1 }
 0x57e   :  { %v1383_v55 = vpop.f32.mrb[1].mxu1 }
 0x57f   :  { %v319_v56 = vpop.f32.mrb[2].mxu1 }
 0x580   :  { %v323_v58 = vpack.c.bf16 %v319_v56, %v316_v54  ;;  %v1384_v59 = vpop.f32.mrb[3].mxu1 }
 0x582   :  { %1406 = vmatmul.mubr.msk.bf16.vlgmr.msra.gmra.mrb[8].mxu1 %vm204_vm2, %v323_v58 }
 0x583   :  { %1417 = vmatprep.mubr.msk.bf16.mxu1 %vm1568_vm1, %v1567_v40 }
 0x587   :  { %v443_v60 = vpop.f32.mrb[4].mxu1 }
 0x588   :  { %v1395_v61 = vpop.f32.mrb[5].mxu1 }
 0x589   :  { %v446_v63 = vpop.f32.mrb[6].mxu1 }
 0x58a   :  { %v450_v2 = vpack.c.bf16 %v446_v63, %v443_v60  ;;  %v1396_v3 = vpop.f32.mrb[7].mxu1 }
 0x58c   :  { %1400 = vmatmul.mubr.msk.bf16.vlgmr.msra.gmra.mrb[12].mxu0 %vm204_vm2, %v450_v2 }
 0x58d   :  { %1410 = vmatpush3.bf16.xpose.msra.mxu0 %v559_v4  ;;  %1411 = vmatprep.mubr.msk.bf16.mxu0 %vm1568_vm1, %v1567_v40 }
 0x58e   :  { %1421 = vmatprep.subr.bf16.mxu0 %v1567_v40 }
 0x594   :  { %1412 = vmatmul.mubr.msk.bf16.vlgmr.msra.gmra.mrb[16].mxu0 %vm204_vm2, %v552_v5 }
 0x595   :  { %1423 = vmatprep.mubr.msk.bf16.mxu0 %vm1568_vm1, %v1567_v40  ;;  %1422 = vmatpush3.bf16.msra.mxu0 %v1472_v50 }
 0x596   :  { %1433 = vmatprep.subr.bf16.mxu0 %v1567_v40 }
 0x655   :  { %v544_v6 = vpop.f32.mrb[8].mxu1 }
 0x656   :  { %v1407_v7 = vpop.f32.mrb[9].mxu1 }
 0x657   :  { %v547_v8 = vpop.f32.mrb[10].mxu1 }
 0x658   :  { %v1408_v9 = vpop.f32.mrb[11].mxu1 }
 0x65f   :  { %v494_v10 = vpop.f32.mrb[12].mxu0 }
 0x660   :  { %v1779_v11 = vadd.f32 %v544_v6, %v494_v10  ;;  %v1401_v12 = vpop.f32.mrb[13].mxu0 }
 0x661   :  { %v497_v13 = vpop.f32.mrb[14].mxu0 }
 0x662   :  { %v1781_v14 = vadd.f32 %v547_v8, %v497_v13  ;;  %v1402_v15 = vpop.f32.mrb[15].mxu0 }
 0x667   :  { %v595_v16 = vpop.f32.mrb[16].mxu0 }
 0x668   :  { %v602_v17 = vmul.f32 0.25, %v595_v16  ;;  %v1413_v18 = vpop.f32.mrb[17].mxu0 }
 0x669   :  { %v598_v19 = vpop.f32.mrb[18].mxu0 }
 0x66a   :  { %v603_v20 = vmul.f32 0.25, %v598_v19  ;;  %v1414_v21 = vpop.f32.mrb[19].mxu0  ;;  %v604_v23 = vadd.f32 %v602_v17, %v1729_v53 }
 0x66c   :  { %v606_v24 = vsel %vm204_vm2, %v604_v23, -inf  ;;  %v605_v25 = vadd.f32 %v603_v20, %v1734_v57 }
 0x66d   :  { %607 = vmax.xlane.f32.xlu1 %v606_v24 }
 0x66e   :  { %v609_v26 = vsel %vm204_vm2, %v605_v25, -inf }
 0x66f   :  { %610 = vmax.xlane.f32.xlu0 %v609_v26 }
 0x6fa   :  { %v608_v27 = vpop.xlane.xlu1 %607 }
 0x6fb   :  { %v612_v28 = vsub.f32 %v604_v23, %v608_v27 }
 0x6fc   :  { %v611_v29 = vpop.xlane.xlu0 %610 }
 0x6fd   :  { %v614_v30 = vmul.f32 1.442695, %v612_v28  ;;  %v613_v31 = vsub.f32 %v605_v25, %v611_v29 }
 0x6ff   :  { %1522 = vpow2.f32 %v614_v30  ;;  %v616_v32 = vmul.f32 1.442695, %v613_v31 }
 0x701   :  { %1524 = vpow2.f32 %v616_v32 }
 0x709   :  { %v1523_v33 = vpop.eup %1522 }
 0x70a   :  { %v618_v34 = vsel %vm204_vm2, %v1523_v33, 0.0 }
 0x70b   :  { %v1525_v35 = vpop.eup %1524  ;;  %619 = vadd.xlane.f32.xlu0 %v618_v34 }
 0x70c   :  { %v621_v36 = vsel %vm204_vm2, %v1525_v35, 0.0 }
 0x70d   :  { %622 = vadd.xlane.f32.xlu1 %v621_v36  ;;  %v1298_v36 = vld [vmem:[%s1950_s6] ss:$0 sm:$0xff] }
 0x71e   :  { %731 = vrot.lane.b32.xlu1 %v1705_v44, %s1574_s22 }
 0x721   :  { %629 = vrot.lane.b32.xlu0 %v1707_v46, %s1572_s1 }
 0x722   :  { %729 = vrot.lane.b32.xlu1 %v1705_v44, %s1575_s23 }
 0x798   :  { %v620_v37 = vpop.xlane.xlu0 %619 }
 0x799   :  { %1526 = vrcp.f32 %v620_v37 }
 0x79a   :  { %v623_v38 = vpop.xlane.xlu1 %622 }
 0x79b   :  { %1528 = vrcp.f32 %v623_v38 }
 0x79c   :  { %v630_v39 = vpop.permute.xlu0 %629 }
 0x79d   :  { %1416 = vmatpush3.bf16.msra.mxu1 %v630_v39 }
 0x79e   :  { %1427 = vmatprep.subr.bf16.mxu1 %v1567_v40  ;;  %v732_v47 = vpop.permute.xlu1 %731 }
 0x79f   :  { %v737_v49 = vsel %vm204_vm2, %v732_v47, 0 }
 0x7a2   :  { %v730_v44 = vpop.permute.xlu1 %729 }
 0x7a3   :  { %v1527_v41 = vpop.eup %1526 }
 0x7a4   :  { %v626_v43 = vmul.f32 %v1527_v41, %v1523_v33 }
 0x7a5   :  { %v1529_v42 = vpop.eup %1528 }
 0x7a6   :  { %v627_v45 = vmul.f32 %v1529_v42, %v1525_v35 }
 0x7a8   :  { %v628_v48 = vpack.c.bf16 %v627_v45, %v626_v43 }
 0x7aa   :  { %1418 = vmatmul.mubr.msk.bf16.vlgmr.msra.gmra.mrb[12].mxu1 %vm204_vm2, %v628_v48 }
 0x7ab   :  { %1428 = vmatpush3.bf16.xpose.msra.mxu1 %v737_v49  ;;  %1429 = vmatprep.mubr.msk.bf16.mxu1 %vm1568_vm1, %v1567_v40 }
 0x7ac   :  { %1439 = vmatprep.subr.bf16.mxu1 %v1567_v40 }
 0x7b2   :  { %1430 = vmatmul.mubr.msk.bf16.vlgmr.msra.gmra.mrb[16].mxu1 %vm204_vm2, %v730_v44 }
 0x7b3   :  { %1441 = vmatprep.mubr.msk.bf16.mxu1 %vm1568_vm1, %v1567_v40 }
 0x87d   :  { %v669_v51 = vpop.f32.mrb[12].mxu1 }
 0x87e   :  { %v1419_v52 = vpop.f32.mrb[13].mxu1 }
 0x87f   :  { %v672_v54 = vpop.f32.mrb[14].mxu1 }
 0x880   :  { %v676_v55 = vpack.c.bf16 %v672_v54, %v669_v51  ;;  %v1420_v56 = vpop.f32.mrb[15].mxu1 }
 0x881   :  { %v1476_v56 = vld [vmem:[%s1953_s9 + $0x4] ss:$8 sps:$4 sm:$0xff]  }
 0x882   :  { %1424 = vmatmul.mubr.msk.bf16.vlgmr.msra.gmra.mrb[20].mxu0 %vm204_vm2, %v676_v55 }
 0x883   :  { %1435 = vmatprep.mubr.msk.bf16.mxu0 %vm1568_vm1, %v1567_v40 }
 0x885   :  { %v773_v58 = vpop.f32.mrb[16].mxu1 }
 0x886   :  { %v780_v59 = vmul.f32 0.25, %v773_v58  ;;  %v1431_v60 = vpop.f32.mrb[17].mxu1  ;;  %v1474_v58 = vld [vmem:[%s1953_s9] ss:$8 sps:$4 sm:$0xff]  }
 0x887   :  { %v776_v61 = vpop.f32.mrb[18].mxu1  ;;  %v1477_v60 = vld [vmem:[%s1953_s9 + $0x10] ss:$8 sps:$4 sm:$0xff]  }
 0x888   :  { %v781_v62 = vmul.f32 0.25, %v776_v61  ;;  %v1432_v63 = vpop.f32.mrb[19].mxu1  ;;  %v782_v2 = vadd.f32 %v780_v59, %v1729_v53  ;;  %v1479_v59 = vld [vmem:[%s1953_s9 + $0x14] ss:$8 sps:$4 sm:$0xff]   ;;  %v1482_v61 = vld [vmem:[%s1953_s9 + $0x24] ss:$8 sps:$4 sm:$0xff]  }
 0x889   :  { %v1483_v63 = vld [vmem:[%s1953_s9 + $0x30] ss:$8 sps:$4 sm:$0xff]  }
 0x88a   :  { %v784_v3 = vsel %vm204_vm2, %v782_v2, -inf  ;;  %v783_v4 = vadd.f32 %v781_v62, %v1734_v57  ;;  %v1480_v62 = vld [vmem:[%s1953_s9 + $0x20] ss:$8 sps:$4 sm:$0xff]  }
 0x88b   :  { %785 = vmax.xlane.f32.xlu1 %v784_v3  ;;  %v1486_v3 = vld [vmem:[%s1955_s11 + $0x40] sm:$0xff]  }
 0x88c   :  { %v787_v5 = vsel %vm204_vm2, %v783_v4, -inf }
 0x88d   :  { %788 = vmax.xlane.f32.xlu0 %v787_v5  ;;  %v1488_v5 = vld [vmem:[%s1955_s11 + $0x48] sm:$0xff]  }
 0x89c   :  { %807 = vrot.lane.b32.xlu1 %v1707_v46, %s1575_s23  ;;  %v1473_v46 = vld [vmem:[%s1949_s5 + $0x18] sm:$0xff]  }
 0x89d   :  { %1440 = vmatpush3.bf16.msra.mxu1 %v1473_v46 }
 0x89e   :  { %1351 = vmatprep.subr.bf16.mxu1 %v1486_v3 }
 0x918   :  { %v786_v40 = vpop.xlane.xlu1 %785 }
 0x919   :  { %v790_v6 = vsub.f32 %v782_v2, %v786_v40  ;;  %v1485_v2 = vld [vmem:[%s1953_s9 + $0x34] ss:$8 sps:$4 sm:$0xff]   ;;  %v1489_v40 = vld [vmem:[%s1955_s11 + $0x8] sm:$0xff]  }
 0x91a   :  { %v789_v7 = vpop.xlane.xlu0 %788 }
 0x91b   :  { %v792_v8 = vmul.f32 1.442695, %v790_v6  ;;  %v791_v9 = vsub.f32 %v783_v4, %v789_v7  ;;  %v1487_v4 = vld [vmem:[%s1955_s11] sm:$0xff]   ;;  %v1490_v6 = vld [vmem:[%s1955_s11 + $0x50] sm:$0xff]  }
 0x91c   :  { %v808_v10 = vpop.permute.xlu1 %807  ;;  %v1491_v7 = vld [vmem:[%s1955_s11 + $0x10] sm:$0xff]  }
 0x91d   :  { %1530 = vpow2.f32 %v792_v8  ;;  %v794_v12 = vmul.f32 1.442695, %v791_v9  ;;  %1434 = vmatpush3.bf16.msra.mxu0 %v808_v10  ;;  %v1492_v8 = vld [vmem:[%s1955_s11 + $0x58] sm:$0xff]   ;;  %v1494_v10 = vld [vmem:[%s1955_s11 + $0x60] sm:$0xff]  }
 0x91e   :  { %1026 = vmatprep.subr.bf16.mxu0 %v1476_v56  ;;  %v1493_v9 = vld [vmem:[%s1955_s11 + $0x18] sm:$0xff]  }
 0x91f   :  { %1532 = vpow2.f32 %v794_v12  ;;  %v1495_v12 = vld [vmem:[%s1955_s11 + $0x20] sm:$0xff]  }
 0x927   :  { %v1531_v53 = vpop.eup %1530 }
 0x928   :  { %v796_v57 = vsel %vm204_vm2, %v1531_v53, 0.0 }
 0x929   :  { %v1533_v13 = vpop.eup %1532  ;;  %797 = vadd.xlane.f32.xlu0 %v796_v57 }
 0x92a   :  { %v799_v15 = vsel %vm204_vm2, %v1533_v13, 0.0 }
 0x92d   :  { %800 = vadd.xlane.f32.xlu0 %v799_v15 }
 0x955   :  { %v720_v16 = vpop.f32.mrb[20].mxu0 }
 0x956   :  { %v727_v17 = vadd.f32 %v720_v16, %v1779_v11  ;;  %v1425_v18 = vpop.f32.mrb[21].mxu0 }
 0x957   :  { %v723_v19 = vpop.f32.mrb[22].mxu0 }
 0x958   :  { %v728_v20 = vadd.f32 %v723_v19, %v1781_v14  ;;  %v1426_v21 = vpop.f32.mrb[23].mxu0 }
 0x9b6   :  { %v798_v23 = vpop.xlane.xlu0 %797 }
 0x9b7   :  { %1534 = vrcp.f32 %v798_v23 }
 0x9ba   :  { %v801_v24 = vpop.xlane.xlu0 %800 }
 0x9bb   :  { %1536 = vrcp.f32 %v801_v24 }
 0x9c1   :  { %v1535_v25 = vpop.eup %1534 }
 0x9c2   :  { %v804_v27 = vmul.f32 %v1535_v25, %v1531_v53  ;;  %v1496_v53 = vld [vmem:[%s1955_s11 + $0x68] sm:$0xff]   ;;  %v1300_v25 = vld [vmem:[%s1952_s8] ss:$0 sm:$0xff] }
 0x9c5   :  { %v1537_v26 = vpop.eup %1536 }
 0x9c6   :  { %v805_v28 = vmul.f32 %v1537_v26, %v1533_v13 }
 0x9c8   :  { %v806_v29 = vpack.c.bf16 %v805_v28, %v804_v27 }
 0x9ca   :  { %1436 = vmatmul.mubr.msk.bf16.vlgmr.msra.gmra.mrb[24].mxu0 %vm204_vm2, %v806_v29 }
 0x9cb   :  { %1058 = vmatprep.mubr.bf16.mxu0 %v1566_v22  ;;  %1027 = vmatpush1.bf16.msra.mxu0 %v1474_v58  ;;  %v1310_v58 = vld [vmem:[%s1956_s12] ss:$0 sm:$0xff] }
 0x9cc   :  { %1028 = vmatprep.subr.bf16.mxu0 %v1479_v59 }
 0x9cf   :  { %1029 = vmatpush1.bf16.msra.mxu0 %v1477_v60 }
 0x9d0   :  { %1030 = vmatprep.subr.bf16.mxu0 %v1482_v61 }
 0x9d3   :  { %1031 = vmatpush1.bf16.msra.mxu0 %v1480_v62 }
 0x9d4   :  { %1032 = vmatprep.subr.bf16.mxu0 %v1485_v2 }
 0x9d7   :  { %1033 = vmatpush1.bf16.msra.mxu0 %v1483_v63 }
 0xa9d   :  { %v847_v30 = vpop.f32.mrb[24].mxu0 }
 0xa9e   :  { %v1437_v11 = vpop.f32.mrb[25].mxu0 }
 0xa9f   :  { %v850_v31 = vpop.f32.mrb[26].mxu0  ;;  %v1498_v11 = vld [vmem:[%s1955_s11 + $0x70] sm:$0xff]  }
 0xaa0   :  { %v854_v32 = vpack.c.bf16 %v850_v31, %v847_v30  ;;  %v1438_v33 = vpop.f32.mrb[27].mxu0  ;;  %v1497_v30 = vld [vmem:[%s1955_s11 + $0x28] sm:$0xff]   ;;  %v1499_v31 = vld [vmem:[%s1955_s11 + $0x30] sm:$0xff]  }
 0xaa1   :  { %v1501_v33 = vld [vmem:[%s1955_s11 + $0x38] sm:$0xff]  }
 0xaa2   :  { %1442 = vmatmul.mubr.msk.bf16.vlgmr.msra.gmra.mrb[20].mxu1 %vm204_vm2, %v854_v32  ;;  %v1500_v32 = vld [vmem:[%s1955_s11 + $0x78] sm:$0xff]  }
 0xaa3   :  { %1352 = vmatpush3.bf16.msra.mxu1 %v1487_v4 }
 0xaa4   :  { %1353 = vmatprep.subr.bf16.mxu1 %v1488_v5 }
 0xaa7   :  { %1354 = vmatpush3.bf16.msra.mxu1 %v1489_v40 }
 0xaa8   :  { %1355 = vmatprep.subr.bf16.mxu1 %v1490_v6 }
 0xaab   :  { %1356 = vmatpush3.bf16.msra.mxu1 %v1491_v7 }
 0xaac   :  { %1357 = vmatprep.subr.bf16.mxu1 %v1492_v8 }
 0xaaf   :  { %1358 = vmatpush3.bf16.msra.mxu1 %v1493_v9 }
 0xab0   :  { %1359 = vmatprep.subr.bf16.mxu1 %v1494_v10 }
 0xab3   :  { %1360 = vmatpush3.bf16.msra.mxu1 %v1495_v12 }
 0xab4   :  { %1361 = vmatprep.subr.bf16.mxu1 %v1496_v53 }
 0xab7   :  { %1362 = vmatpush3.bf16.msra.mxu1 %v1497_v30 }
 0xab8   :  { %1363 = vmatprep.subr.bf16.mxu1 %v1498_v11 }
 0xabb   :  { %1364 = vmatpush3.bf16.msra.mxu1 %v1499_v31 }
 0xabc   :  { %1365 = vmatprep.subr.bf16.mxu1 %v1500_v32 }
 0xabf   :  { %1366 = vmatpush3.bf16.msra.mxu1 %v1501_v33 }
 0xb75   :  { %v898_v14 = vpop.f32.mrb[20].mxu1 }
 0xb76   :  { %v905_v34 = vadd.f32 %v898_v14, %v727_v17  ;;  %v1443_v35 = vpop.f32.mrb[21].mxu1  ;;  %v973_v14 = vlaneseq }
 0xb77   :  { %v901_v37 = vpop.f32.mrb[22].mxu1 }
 0xb78   :  { %v907_v38 = vadd.f32 %v905_v34, %v1652_v0  ;;  %v906_v39 = vadd.f32 %v901_v37, %v728_v20  ;;  %v1444_v41 = vpop.f32.mrb[23].mxu1  ;;  %v1299_v20 = vld [vmem:[%s1951_s7] ss:$0 sm:$0xff]  ;;  %v974_v34 = vshrl.u32 %v973_v14, 7 }
 0xb7a   :  { %v1830_v22 = vadd.f32 %v1298_v36, %v907_v38  ;;  %v908_v42 = vadd.f32 %v906_v39, %v1657_v1  ;;  %v975_v35 = vsub.s32 0, %v974_v34  ;;  %v979_v37 = vsub.s32 1, %v974_v34 }
 0xb7c   :  { %v1833_v43 = vadd.f32 %v1298_v36, %v908_v42  ;;  %v920_v45 = vsel %vm50_vm0, %v1830_v22, 0.0  ;;  %v971_v36 = vld [vmem:[%s1954_s10] sm:$0x3] }
 0xb7d   :  { %921 = vadd.xlane.f32.xlu0 %v920_v45  ;;  %v976_v38 = vrot.slane %v971_v36, %v975_v35  ;;  %v980_v39 = vrot.slane %v971_v36, %v979_v37 }
 0xb7e   :  { %v923_v47 = vsel %vm50_vm0, %v1833_v43, 0.0 }
 0xb81   :  { %924 = vadd.xlane.f32.xlu0 %v923_v47 }
 0xc0a   :  { %v922_v48 = vpop.xlane.xlu0 %921 }
 0xc0b   :  { %v926_v49 = vmul.f32 0.015625, %v922_v48 }
 0xc0d   :  { %v928_v0 = vsub.f32 %v1830_v22, %v926_v49 }
 0xc0e   :  { %v925_v44 = vpop.xlane.xlu0 %924 }
 0xc0f   :  { %v927_v50 = vmul.f32 0.015625, %v925_v44  ;;  %v930_v51 = vmul.f32 %v928_v0, %v928_v0 }
 0xc11   :  { %v929_v52 = vsub.f32 %v1833_v43, %v927_v50  ;;  %v932_v1 = vsel %vm50_vm0, %v930_v51, 0.0 }
 0xc12   :  { %933 = vadd.xlane.f32.xlu0 %v932_v1 }
 0xc13   :  { %v931_v54 = vmul.f32 %v929_v52, %v929_v52 }
 0xc15   :  { %v935_v55 = vsel %vm50_vm0, %v931_v54, 0.0 }
 0xc16   :  { %936 = vadd.xlane.f32.xlu0 %v935_v55 }
 0xc9f   :  { %v934_v57 = vpop.xlane.xlu0 %933 }
 0xca0   :  { %v938_v13 = vmul.f32 0.015625, %v934_v57 }
 0xca2   :  { %v940_v15 = vadd.f32 1e-05, %v938_v13 }
 0xca3   :  { %v937_v46 = vpop.xlane.xlu0 %936 }
 0xca4   :  { %1538 = vrsqrt.f32 %v940_v15  ;;  %v939_v16 = vmul.f32 0.015625, %v937_v46 }
 0xca6   :  { %v941_v17 = vadd.f32 1e-05, %v939_v16 }
 0xca8   :  { %1540 = vrsqrt.f32 %v941_v17 }
 0xcae   :  { %v1539_v18 = vpop.eup %1538 }
 0xcaf   :  { %v944_v19 = vmul.f32 %v1539_v18, %v928_v0 }
 0xcb1   :  { %v952_v23 = vmul.f32 %v1299_v20, %v944_v19 }
 0xcb2   :  { %v1541_v21 = vpop.eup %1540 }
 0xcb3   :  { %v945_v24 = vmul.f32 %v1541_v21, %v929_v52  ;;  %v960_v27 = vadd.f32 %v1300_v25, %v952_v23 }
 0xcb5   :  { %v953_v26 = vmul.f32 %v1299_v20, %v945_v24 }
 0xcb7   :  { %v961_v28 = vadd.f32 %v1300_v25, %v953_v26 }
 0xcb9   :  { %v962_v29 = vpack.c.bf16 %v961_v28, %v960_v27 }
 0xcbb   :  { %1309 = vmatmul.mubr.msk.bf16.vlgmr.msra.gmra.mrb[28].mxu0 %vm50_vm0, %v962_v29 }
 0xd8e   :  { %v1060_v41 = vpop.f32.mrb[28].mxu0 }
 0xd8f   :  { %v1061_v42 = vadd.f32 %v1060_v41, %v976_v38  ;;  %v1062_v45 = vpop.f32.mrb[29].mxu0 }
 0xd90   :  { %v1063_v47 = vadd.f32 %v1062_v45, %v980_v39  ;;  %v1064_v48 = vpop.f32.mrb[30].mxu0 }
 0xd91   :  { %v1065_v49 = vadd.f32 %v1064_v48, %v976_v38  ;;  %v1066_v0 = vpop.f32.mrb[31].mxu0  ;;  %v1069_v50 = vmax.f32 %v1061_v42, 0.0 }
 0xd92   :  { %v1067_v44 = vadd.f32 %v1066_v0, %v980_v39  ;;  %v1070_v52 = vmax.f32 %v1063_v47, 0.0 }
 0xd93   :  { %v1071_v51 = vmax.f32 %v1065_v49, 0.0 }
 0xd94   :  { %v1072_v1 = vmax.f32 %v1067_v44, 0.0 }
 0xd95   :  { %v1073_v54 = vpack.c.bf16 %v1071_v51, %v1069_v50 }
 0xd96   :  { %v1074_v55 = vpack.c.bf16 %v1072_v1, %v1070_v52 }
 0xd98   :  { %1242 = vmatprep.mubr.bf16.mxu1 %v1074_v55 }
 0xd99   :  { %1243 = vmatmul.mubr.bf16.vlgmr.msra.gmra.mrb[24].mxu1 %v1073_v54 }
 0xe6c   :  { %v1367_v56 = vpop.f32.mrb[24].mxu1 }
 0xe6d   :  { %v1368_v59 = vpop.f32.mrb[25].mxu1 }
 0xe6e   :  { %v1369_v60 = vadd.f32 %v1368_v59, %v1367_v56  ;;  %v1370_v61 = vpop.f32.mrb[26].mxu1 }
 0xe6f   :  { %v1371_v62 = vpop.f32.mrb[27].mxu1 }
 0xe70   :  { %v1245_v63 = vadd.f32 %v1369_v60, %v1310_v58  ;;  %v1372_v2 = vadd.f32 %v1371_v62, %v1370_v61 }
 0xe72   :  { %v1251_v3 = vadd.f32 %v1245_v63, %v1830_v22  ;;  %v1248_v4 = vadd.f32 %v1372_v2, %v1310_v58 }
 0xe74   :  { %1253 = vst.msk [vmem:[#allocation2] sm:$0xff] %vm50_vm0, %v1251_v3  ;;  %v1252_v5 = vadd.f32 %v1248_v4, %v1833_v43 }
 0xe76   :  { %1254 = vst.msk [vmem:[#allocation2 + $0x8] sm:$0xff] %vm50_vm0, %v1252_v5 }
 0xe77   :  { %1553 = shalt.err (!%p1550_p4)
}
 0xe78   :  { %s1554_s30 = scalar_lea.hbm %s1957_s13, 256 }
 0xe79   :  { %p1555_p5 = scmp.ne.s32.totalorder %s1957_s13, %s1554_s30  ;;  %p1558_p6 = scmp.lt.u32.totalorder %s1554_s30, %s1957_s13 }
 0xe7b   :  { %p1560_p7 = pnand %p1558_p6, %p1555_p5 }
 0xe7d   :  { %1563 = shalt.err (!%p1560_p7)
}
 0xe7e   :  { %s1577_s17 = smov 128   ;;  %s1578_s18 = smov 8  }
 0xe7f   :  { %1266 = dma.vmem_to_hbm [thread:$0]  %s1261_s2, 256, %s1957_s13, [#allocation3], %s1577_s17, %s1577_s17, %s1578_s18  }
 0xe80   :  { %1564 = dma.done.wait [#allocation3], 256  }
 0xe81   :  { %1565 = vsyncadd [#allocation3], 4294967040 }
 0xe82   :  { %1270 = vsyncpa [#allocation3], 1 }

</bundles_post_ra>
